<compile_context>
chip_gen: v6e
topology: v6e:2x2x1
jax: 0.10.0
libtpu: 0.0.40
codegen_flags: <defaults>
</compile_context>

<pallas_src>
import functools
import math

import jax
import jax.numpy as jnp
from jax.experimental import pallas as pl
from jax.experimental.pallas import tpu as pltpu

LANE = 128     # last-dim tile width (vreg lanes / MXU)
SUBLANE = 8    # second-to-last-dim tile (f32 sublanes)


def _round_up(x, m):
    return (x + m - 1) // m * m


def _vmem_clamp_bytes():
    """Generation-aware VMEM cap: ~7/8 of physical (≈56 MiB v7x, ≈112 MiB v5e/v6e)."""
    try:
        cap = int(pltpu.get_tpu_info().vmem_capacity_bytes)
    except Exception:
        cap = 64 << 20  # conservative fallback if the query is unavailable
    return (cap * 7) // 8


def _make_fused_mlp_kernel(n_layers, output_activation, din, din_pad):
    """Kernel computing the full MLP for one batch tile.

    refs = (x_ref, w0, b0, w1, b1, ..., w{n-1}, b{n-1}, o_ref)
    """

    def kernel(*refs):
        x_ref = refs[0]
        o_ref = refs[-1]
        wb = refs[1:-1]

        # Load the unpadded input tile and zero-extend the lane dim in VMEM
        # (f32 concat: native (8,128) layout, exact zeros for padded lanes).
        h = x_ref[...].astype(jnp.float32)
        if din_pad != din:
            zeros = jnp.zeros((h.shape[0], din_pad - din), jnp.float32)
            h = jnp.concatenate([h, zeros], axis=-1)

        for i in range(n_layers):
            w = wb[2 * i][...]
            b = wb[2 * i + 1][...]
            # MXU matmul with bf16 (weight-dtype) operands, f32 accumulation.
            h = jnp.dot(h.astype(w.dtype), w, preferred_element_type=jnp.float32)
            h = h + b.astype(jnp.float32)          # (1, D) broadcasts over rows
            if i < n_layers - 1 or output_activation == "relu":
                h = jnp.maximum(h, 0.0)            # hidden ReLU (or relu head)
            elif output_activation == "tanh":
                h = jnp.tanh(h)
            # output_activation is None -> identity
        o_ref[...] = h.astype(o_ref.dtype)

    return kernel


@functools.partial(
    jax.jit, static_argnames=("output_activation", "out_dim", "batch_tile"))
def fc_network_forward(x, padded_params, output_activation=None, *, out_dim,
                       batch_tile=512):
    """Fused MLP forward. `padded_params` come from pad_fc_params()."""
    B, din = x.shape
    n_layers = len(padded_params)
    din_pad = padded_params[0][0].shape[0]
    dout_pad = padded_params[-1][0].shape[1]

    # Batch tiling: near-minimal padding, and >=2 grid steps when B is large
    # enough so the "parallel" axis shards across v7x's two TensorCores.
    bt = _round_up(max(batch_tile, SUBLANE), SUBLANE)
    min_steps = 2 if B >= 2 * SUBLANE else 1
    n_steps = max(-(-B // bt), min_steps)
    tb = min(_round_up(-(-B // n_steps), SUBLANE), bt)
    b_pad = tb * n_steps
    grid = (n_steps,)

    # Only the (cheap, sublane-sized) batch dim is padded in HBM; the feature
    # dim stays unpadded and is zero-extended inside the kernel.
    x_pad = x if b_pad == B else jnp.pad(x, ((0, b_pad - B), (0, 0)))

    flat_wb = []
    in_specs = [pl.BlockSpec((tb, din), lambda i: (i, 0))]
    resident_bytes = 0
    for w_p, b_p in padded_params:
        dpi, dpo = w_p.shape
        flat_wb.extend((w_p, b_p))
        # Constant index_map + single buffer: fetched once, VMEM-resident,
        # never re-DMAed and never double-buffered.
        in_specs.append(pl.BlockSpec((dpi, dpo), lambda i: (0, 0),
                                     pipeline_mode=pl.Buffered(1)))
        in_specs.append(pl.BlockSpec((1, dpo), lambda i: (0, 0),
                                     pipeline_mode=pl.Buffered(1)))
        resident_bytes += (w_p.size * w_p.dtype.itemsize
                           + b_p.size * b_p.dtype.itemsize)
    out_specs = pl.BlockSpec((tb, dout_pad), lambda i: (i, 0))

    # VMEM budget: double-buffered x/out tiles + single-buffered resident
    # weights/biases + f32 intermediates/cast copies + slack, clamped to a
    # generation-aware fraction of physical VMEM.
    max_width = max(din_pad, *(w.shape[1] for w, _ in padded_params))
    vmem = 2 * tb * din * x.dtype.itemsize            # x tiles (2 buffers)
    vmem += 2 * tb * dout_pad * x.dtype.itemsize      # out tiles (2 buffers)
    vmem += resident_bytes                            # weights/biases (1 buffer)
    vmem += 4 * tb * max_width * 4                    # f32 intermediates / casts
    vmem_limit = int(min(max(vmem + (2 << 20), 4 << 20), _vmem_clamp_bytes()))

    kernel = _make_fused_mlp_kernel(n_layers, output_activation, din, din_pad)
    out_pad = pl.pallas_call(
        kernel,
        out_shape=jax.ShapeDtypeStruct((b_pad, dout_pad), x.dtype),
        grid=grid,
        in_specs=in_specs,
        out_specs=out_specs,
        compiler_params=pltpu.CompilerParams(
            dimension_semantics=("parallel",),
            vmem_limit_bytes=vmem_limit,
        ),
    )(x_pad, *flat_wb)

    return out_pad[:B, :out_dim]


def init_fc_params(key, dims, dtype=jnp.float32):
    """PyTorch-style nn.Linear init: U(-1/sqrt(fan_in), 1/sqrt(fan_in)).

    W is stored as (in, out) — the transpose of PyTorch's (out, in) layout.
    """
    params = []
    for i in range(len(dims) - 1):
        fan_in, fan_out = dims[i], dims[i + 1]
        key, kw, kb = jax.random.split(key, 3)
        bound = 1.0 / math.sqrt(float(fan_in))
        w = jax.random.uniform(kw, (fan_in, fan_out), jnp.float32, -bound, bound)
        b = jax.random.uniform(kb, (fan_out,), jnp.float32, -bound, bound)
        params.append((w.astype(dtype), b.astype(dtype)))
    return params


def pad_fc_params(params, weight_dtype=jnp.bfloat16):
    """Zero-pad weights/biases once (outside the jitted path) to 128-lane shapes.

    Weights are stored in bf16 for the MXU (f32 accumulation happens in-kernel);
    biases stay f32 as (1, D_pad) so no per-call reshape is needed.
    """
    padded = []
    for w, b in params:
        din, dout = w.shape
        dpi, dpo = _round_up(din, LANE), _round_up(dout, LANE)
        w_p = jnp.pad(w, ((0, dpi - din), (0, dpo - dout))).astype(weight_dtype)
        b_p = jnp.pad(b.reshape(1, dout), ((0, 0), (0, dpo - dout))).astype(jnp.float32)
        padded.append((w_p, b_p))
    return tuple(padded)


def fc_network_ref(x, params, output_activation=None, matmul_dtype=jnp.float32):
    """Pure-JAX reference (unpadded params) for validation.

    With matmul_dtype=jnp.bfloat16 this mirrors the kernel's compute (bf16
    operands, f32 accumulation, f32 bias/activation).
    """
    n_layers = len(params)
    h = x
    for i, (w, b) in enumerate(params):
        h = jnp.dot(h.astype(matmul_dtype), w.astype(matmul_dtype),
                    preferred_element_type=jnp.float32) + b.astype(jnp.float32)
        if i < n_layers - 1 or output_activation == "relu":
            h = jnp.maximum(h, 0.0)
        elif output_activation == "tanh":
            h = jnp.tanh(h)
    return h


if __name__ == "__main__":
    # Small MLP consistent with the DDPG FCNetwork usage (actor head):
    # dims = (obs_dim=16, hidden=32, hidden=32, act_dim=8), output_activation=Tanh.
    dims = (16, 32, 32, 8)
    batch = 2
    output_activation = "tanh"

    key = jax.random.PRNGKey(0)
    key, kx = jax.random.split(key)
    x = jax.random.normal(kx, (batch, dims[0]), dtype=jnp.float32)
    params = init_fc_params(key, dims)

    # Pad/convert parameters ONCE; reused across every forward call.
    padded_params = pad_fc_params(params)   # bf16 weights, f32 biases

    out = fc_network_forward(
        x, padded_params, output_activation=output_activation, out_dim=dims[-1])
    out = jax.block_until_ready(out)

    assert out.shape == (batch, dims[-1]), out.shape
    # Tight check vs. a reference that mirrors the kernel's bf16-operand compute.
    ref_bf16 = fc_network_ref(x, params, output_activation,
                              matmul_dtype=jnp.bfloat16)
    assert jnp.allclose(out, ref_bf16, atol=2e-3, rtol=2e-3), \
        "mismatch vs bf16 reference"
    # Loose sanity check vs. the pure-f32 (PyTorch-equivalent) reference.
    ref_f32 = fc_network_ref(x, params, output_activation)
    assert jnp.allclose(out, ref_f32, atol=5e-2, rtol=5e-2), \
        "mismatch vs f32 reference"

    print("KERNEL_OK")
</pallas_src>

<mosaic_0001>
module attributes {stable_mosaic.version = 11 : i64} {
  func.func @kernel(%arg0: i32, %arg1: memref<8x16xf32, #tpu.memory_space<vmem>>, %arg2: memref<128x128xbf16, #tpu.memory_space<vmem>>, %arg3: memref<1x128xf32, #tpu.memory_space<vmem>>, %arg4: memref<128x128xbf16, #tpu.memory_space<vmem>>, %arg5: memref<1x128xf32, #tpu.memory_space<vmem>>, %arg6: memref<128x128xbf16, #tpu.memory_space<vmem>>, %arg7: memref<1x128xf32, #tpu.memory_space<vmem>>, %arg8: memref<8x128xf32, #tpu.memory_space<vmem>>) attributes {dimension_semantics = [#tpu.dimension_semantics<parallel>], iteration_bounds = array<i64: 1>, scalar_prefetch = 0 : i64, scratch_operands = 0 : i64, tpu.core_type = #tpu.core_type<tc>, window_params = [{transform_indices = @transform_0, window_bounds = array<i64: 8, 16>}, {pipeline_mode = #tpu.pipeline_mode<synchronous>, transform_indices = @transform_1, window_bounds = array<i64: 128, 128>}, {pipeline_mode = #tpu.pipeline_mode<synchronous>, transform_indices = @transform_2, window_bounds = array<i64: 1, 128>}, {pipeline_mode = #tpu.pipeline_mode<synchronous>, transform_indices = @transform_3, window_bounds = array<i64: 128, 128>}, {pipeline_mode = #tpu.pipeline_mode<synchronous>, transform_indices = @transform_4, window_bounds = array<i64: 1, 128>}, {pipeline_mode = #tpu.pipeline_mode<synchronous>, transform_indices = @transform_5, window_bounds = array<i64: 128, 128>}, {pipeline_mode = #tpu.pipeline_mode<synchronous>, transform_indices = @transform_6, window_bounds = array<i64: 1, 128>}, {transform_indices = @transform_7, window_bounds = array<i64: 8, 128>}]} {
    %c0 = arith.constant 0 : index
    %c0_0 = arith.constant 0 : index
    %0 = vector.load %arg1[%c0, %c0_0] : memref<8x16xf32, #tpu.memory_space<vmem>>, vector<8x16xf32>
    %cst = arith.constant 0.000000e+00 : f32
    %1 = vector.broadcast %cst : f32 to vector<8x112xf32>
    %2 = tpu.concatenate %0, %1 in 1 : vector<8x16xf32>, vector<8x112xf32> -> vector<8x128xf32>
    %c0_1 = arith.constant 0 : index
    %c0_2 = arith.constant 0 : index
    %3 = vector.load %arg2[%c0_1, %c0_2] : memref<128x128xbf16, #tpu.memory_space<vmem>>, vector<128x128xbf16>
    %c0_3 = arith.constant 0 : index
    %c0_4 = arith.constant 0 : index
    %4 = vector.load %arg3[%c0_3, %c0_4] : memref<1x128xf32, #tpu.memory_space<vmem>>, vector<1x128xf32>
    %5 = arith.truncf %2 : vector<8x128xf32> to vector<8x128xbf16>
    %cst_5 = arith.constant dense<0.000000e+00> : vector<8x128xf32>
    %6 = tpu.matmul %5, %3, %cst_5 {dimension_numbers = #tpu.dot_dimension_numbers<[1], [0], [0], [1], [0, 0, 1, 1], [], []>} : vector<8x128xbf16>, vector<128x128xbf16>, vector<8x128xf32> -> vector<8x128xf32>
    %7 = vector.broadcast %4 : vector<1x128xf32> to vector<8x128xf32>
    %8 = arith.addf %6, %7 : vector<8x128xf32>
    %cst_6 = arith.constant 0.000000e+00 : f32
    %9 = vector.broadcast %cst_6 : f32 to vector<8x128xf32>
    %10 = arith.maximumf %8, %9 : vector<8x128xf32>
    %c0_7 = arith.constant 0 : index
    %c0_8 = arith.constant 0 : index
    %11 = vector.load %arg4[%c0_7, %c0_8] : memref<128x128xbf16, #tpu.memory_space<vmem>>, vector<128x128xbf16>
    %c0_9 = arith.constant 0 : index
    %c0_10 = arith.constant 0 : index
    %12 = vector.load %arg5[%c0_9, %c0_10] : memref<1x128xf32, #tpu.memory_space<vmem>>, vector<1x128xf32>
    %13 = arith.truncf %10 : vector<8x128xf32> to vector<8x128xbf16>
    %cst_11 = arith.constant dense<0.000000e+00> : vector<8x128xf32>
    %14 = tpu.matmul %13, %11, %cst_11 {dimension_numbers = #tpu.dot_dimension_numbers<[1], [0], [0], [1], [0, 0, 1, 1], [], []>} : vector<8x128xbf16>, vector<128x128xbf16>, vector<8x128xf32> -> vector<8x128xf32>
    %15 = vector.broadcast %12 : vector<1x128xf32> to vector<8x128xf32>
    %16 = arith.addf %14, %15 : vector<8x128xf32>
    %cst_12 = arith.constant 0.000000e+00 : f32
    %17 = vector.broadcast %cst_12 : f32 to vector<8x128xf32>
    %18 = arith.maximumf %16, %17 : vector<8x128xf32>
    %c0_13 = arith.constant 0 : index
    %c0_14 = arith.constant 0 : index
    %19 = vector.load %arg6[%c0_13, %c0_14] : memref<128x128xbf16, #tpu.memory_space<vmem>>, vector<128x128xbf16>
    %c0_15 = arith.constant 0 : index
    %c0_16 = arith.constant 0 : index
    %20 = vector.load %arg7[%c0_15, %c0_16] : memref<1x128xf32, #tpu.memory_space<vmem>>, vector<1x128xf32>
    %21 = arith.truncf %18 : vector<8x128xf32> to vector<8x128xbf16>
    %cst_17 = arith.constant dense<0.000000e+00> : vector<8x128xf32>
    %22 = tpu.matmul %21, %19, %cst_17 {dimension_numbers = #tpu.dot_dimension_numbers<[1], [0], [0], [1], [0, 0, 1, 1], [], []>} : vector<8x128xbf16>, vector<128x128xbf16>, vector<8x128xf32> -> vector<8x128xf32>
    %23 = vector.broadcast %20 : vector<1x128xf32> to vector<8x128xf32>
    %24 = arith.addf %22, %23 : vector<8x128xf32>
    %25 = math.tanh %24 : vector<8x128xf32>
    %c0_18 = arith.constant 0 : index
    %c0_19 = arith.constant 0 : index
    %26 = vector.load %arg8[%c0_18, %c0_19] : memref<8x128xf32, #tpu.memory_space<vmem>>, vector<8x128xf32>
    tpu.vector_store %arg8[%c0_18, %c0_19], %25 {strides = array<i32>} : memref<8x128xf32, #tpu.memory_space<vmem>>, vector<8x128xf32>,
    return
  }
  func.func @transform_0(%arg0: i32) -> (i32, i32) {
    %c0_i32 = arith.constant 0 : i32
    %c0_i32_0 = arith.constant 0 : i32
    return %arg0, %c0_i32 : i32, i32
  }
  func.func @transform_1(%arg0: i32) -> (i32, i32) {
    %c0_i32 = arith.constant 0 : i32
    %c0_i32_0 = arith.constant 0 : i32
    %c0_i32_1 = arith.constant 0 : i32
    return %c0_i32, %c0_i32_0 : i32, i32
  }
  func.func @transform_2(%arg0: i32) -> (i32, i32) {
    %c0_i32 = arith.constant 0 : i32
    %c0_i32_0 = arith.constant 0 : i32
    %c0_i32_1 = arith.constant 0 : i32
    return %c0_i32, %c0_i32_0 : i32, i32
  }
  func.func @transform_3(%arg0: i32) -> (i32, i32) {
    %c0_i32 = arith.constant 0 : i32
    %c0_i32_0 = arith.constant 0 : i32
    %c0_i32_1 = arith.constant 0 : i32
    return %c0_i32, %c0_i32_0 : i32, i32
  }
  func.func @transform_4(%arg0: i32) -> (i32, i32) {
    %c0_i32 = arith.constant 0 : i32
    %c0_i32_0 = arith.constant 0 : i32
    %c0_i32_1 = arith.constant 0 : i32
    return %c0_i32, %c0_i32_0 : i32, i32
  }
  func.func @transform_5(%arg0: i32) -> (i32, i32) {
    %c0_i32 = arith.constant 0 : i32
    %c0_i32_0 = arith.constant 0 : i32
    %c0_i32_1 = arith.constant 0 : i32
    return %c0_i32, %c0_i32_0 : i32, i32
  }
  func.func @transform_6(%arg0: i32) -> (i32, i32) {
    %c0_i32 = arith.constant 0 : i32
    %c0_i32_0 = arith.constant 0 : i32
    %c0_i32_1 = arith.constant 0 : i32
    return %c0_i32, %c0_i32_0 : i32, i32
  }
  func.func @transform_7(%arg0: i32) -> (i32, i32) {
    %c0_i32 = arith.constant 0 : i32
    %c0_i32_0 = arith.constant 0 : i32
    return %arg0, %c0_i32 : i32, i32
  }
}

</mosaic_0001>

<bundles_post_ra>
// kernel: fc_network_forward.1
= control target key start
LH: loop header
LB: loop body
LE: loop exit
PB: predicated region body
PF: predicated region fallthrough
CT: control target
= control target key end

     0   :  { %12 = vsyncpa [#allocation3], 0  ;;  %s732_s0 = inlined_call_operand.vmem [shape: f32[8,16], index: 0, kind: input, shape index: {}]   ;;  %s733_s1 = inlined_call_operand.hbm [shape: bf16[128,128], index: 1, kind: input, shape index: {}]   ;;  %s734_s2 = inlined_call_operand.vmem [shape: f32[1,128], index: 2, kind: input, shape index: {}]   ;;  %s735_s3 = inlined_call_operand.hbm [shape: bf16[128,128], index: 3, kind: input, shape index: {}]   ;;  %s736_s4 = inlined_call_operand.vmem [shape: f32[1,128], index: 4, kind: input, shape index: {}]   ;;  %s737_s5 = inlined_call_operand.hbm [shape: bf16[128,128], index: 5, kind: input, shape index: {}]   ;;  %s738_s6 = inlined_call_operand.vmem [shape: f32[1,128], index: 6, kind: input, shape index: {}]   ;;  %s739_s7 = inlined_call_operand.vmem [shape: f32[8,128], index: 7, kind: output, shape index: {}]  }
   0x1   :  { %13 = vsyncpa [#allocation5], 0  ;;  %s631_s24 = smov [#allocation4]   ;;  %s632_s26 = smov [#allocation2]  }
   0x2   :  { %s35_s25 = sshll.u32 %s631_s24, 4  ;;  %s21_s27 = sshll.u32 %s632_s26, 4  ;;  %s36_s25 = int_to_ptr.vmem [resolvable:$true] %s35_s25  ;;  %s22_s27 = int_to_ptr.vmem [resolvable:$true] %s21_s27 }
   0x3   :  { %s575_s28 = scalar_lea.vmem %s36_s25, 1024  ;;  %p580_p1 = scmp.lt.s32.totalorder %s36_s25, %s36_s25 }
   0x4   :  { %p576_p0 = scmp.ne.s32.totalorder %s36_s25, %s575_s28  ;;  %p581_p2 = scmp.lt.s32.totalorder %s575_s28, %s575_s28 }
   0x6   :  { %p582_p3 = por %p581_p2, %p580_p1 }
   0x8   :  { %p583_p4 = pnand %p582_p3, %p576_p0 }
   0xa   :  { %586 = shalt.err (!%p583_p4)
}
   0xb   :  { %s633_s29 = smov 64   ;;  %s634_s30 = smov 4  }
   0xc   :  { %41 = dma.hbm_to_vmem [thread:$0]  %s735_s3, 1024, %s36_s25, [#allocation5], %s633_s29, %s633_s29, %s634_s30  }
   0xd   :  { %s595_s10 = scalar_lea.vmem %s22_s27, 1024  ;;  %p600_p6 = scmp.lt.s32.totalorder %s22_s27, %s22_s27 }
   0xe   :  { %p596_p5 = scmp.ne.s32.totalorder %s22_s27, %s595_s10  ;;  %p601_p7 = scmp.lt.s32.totalorder %s595_s10, %s595_s10 }
  0x10   :  { %p602_p8 = por %p601_p7, %p600_p6 }
  0x12   :  { %p603_p9 = pnand %p602_p8, %p596_p5 }
  0x14   :  { %606 = shalt.err (!%p603_p9)
}
  0x15   :  { %27 = dma.hbm_to_vmem [thread:$0]  %s733_s1, 1024, %s22_s27, [#allocation3], %s633_s29, %s633_s29, %s634_s30  }
  0x16   :  { %s635_s13 = smov [#allocation6]  }
  0x17   :  { %s49_s14 = sshll.u32 %s635_s13, 4  ;;  %s50_s14 = int_to_ptr.vmem [resolvable:$true] %s49_s14 }
  0x18   :  { %s615_s15 = scalar_lea.vmem %s50_s14, 1024  ;;  %p620_p11 = scmp.lt.s32.totalorder %s50_s14, %s50_s14 }
  0x19   :  { %p616_p10 = scmp.ne.s32.totalorder %s50_s14, %s615_s15  ;;  %p621_p12 = scmp.lt.s32.totalorder %s615_s15, %s615_s15 }
  0x1b   :  { %p622_p13 = por %p621_p12, %p620_p11 }
  0x1d   :  { %p623_p0 = pnand %p622_p13, %p616_p10 }
  0x1f   :  { %626 = shalt.err (!%p623_p0)
}
  0x20   :  { %55 = dma.hbm_to_vmem [thread:$0]  %s737_s5, 1024, %s50_s14, [#allocation5], %s633_s29, %s633_s29, %s634_s30  }
  0x21   :  { %627 = dma.done.wait [#allocation3], 1024  }
  0x22   :  { %628 = vsyncadd [#allocation3], 4294966272 }
  0x23   :  { %629 = dma.done.wait [#allocation5], 2048  }
  0x24   :  { %630 = vsyncadd [#allocation5], 4294965248  ;;  %v636_v0 = vmov 0.0   ;;  %vm637_vm0 = vmmov 0   ;;  %v541_v1 = vld [vmem:[#allocation2 + $0x38] sm:$0xff]   ;;  %v542_v2 = vld [vmem:[#allocation2 + $0x30] sm:$0xff]  }
  0x25   :  { %474 = vmatprep.subr.bf16.mxu0 %v636_v0  ;;  %490 = vmatprep.mubr.msk.bf16.mxu0 %vm637_vm0, %v636_v0  ;;  %v543_v3 = vld [vmem:[#allocation2 + $0x28] sm:$0xff]   ;;  %v549_v4 = vld [vmem:[#allocation4 + $0x38] sm:$0xff]   ;;  %v544_v5 = vld [vmem:[#allocation2 + $0x20] sm:$0xff]   ;;  %vm69_vm1 = vcmask 130048  }
  0x26   :  { %494 = vmatprep.subr.bf16.mxu1 %v636_v0  ;;  %510 = vmatprep.mubr.msk.bf16.mxu1 %vm637_vm0, %v636_v0  ;;  %v550_v6 = vld [vmem:[#allocation4 + $0x30] sm:$0xff]   ;;  %v545_v7 = vld [vmem:[#allocation2 + $0x18] sm:$0xff]   ;;  %v551_v8 = vld [vmem:[#allocation4 + $0x28] sm:$0xff]  }
  0x27   :  { %475 = vmatpush3.bf16.msra.mxu0 %v541_v1  ;;  %495 = vmatpush3.bf16.msra.mxu1 %v549_v4  ;;  %v546_v9 = vld [vmem:[#allocation2 + $0x10] sm:$0xff]   ;;  %v552_v10 = vld [vmem:[#allocation4 + $0x20] sm:$0xff]   ;;  %v547_v11 = vld [vmem:[#allocation2 + $0x8] sm:$0xff]  }
  0x28   :  { %476 = vmatprep.subr.bf16.mxu0 %v636_v0  ;;  %496 = vmatprep.subr.bf16.mxu1 %v636_v0  ;;  %v553_v12 = vld [vmem:[#allocation4 + $0x18] sm:$0xff]   ;;  %v548_v13 = vld [vmem:[#allocation2] sm:$0xff]   ;;  %v554_v15 = vld [vmem:[#allocation4 + $0x10] sm:$0xff]  }
  0x29   :  { %v68_v14 = vld [vmem:[%s732_s0] sm:$0xff]  ;;  %vm426_vm2 = vmpackc.low %vm69_vm1, %vm69_vm1  ;;  %v555_v17 = vld [vmem:[#allocation4 + $0x8] sm:$0xff]  }
  0x2a   :  { %v427_v16 = vpack.c.bf16 %v68_v14, %v68_v14  ;;  %v556_v18 = vld [vmem:[#allocation4] sm:$0xff]   ;;  %v557_v19 = vld [vmem:[#allocation6 + $0x38] sm:$0xff]   ;;  %v558_v20 = vld [vmem:[#allocation6 + $0x30] sm:$0xff]  }
  0x2b   :  { %477 = vmatpush3.bf16.msra.mxu0 %v542_v2  ;;  %497 = vmatpush3.bf16.msra.mxu1 %v550_v6  ;;  %v559_v21 = vld [vmem:[#allocation6 + $0x28] sm:$0xff]   ;;  %v560_v22 = vld [vmem:[#allocation6 + $0x20] sm:$0xff]   ;;  %v561_v23 = vld [vmem:[#allocation6 + $0x18] sm:$0xff]  }
  0x2c   :  { %478 = vmatprep.subr.bf16.mxu0 %v636_v0  ;;  %498 = vmatprep.subr.bf16.mxu1 %v636_v0  ;;  %v562_v24 = vld [vmem:[#allocation6 + $0x10] sm:$0xff]   ;;  %v417_v25 = vld [vmem:[%s734_s2] ss:$0 sm:$0xff]  ;;  %v563_v33 = vld [vmem:[#allocation6 + $0x8] sm:$0xff]  }
  0x2d   :  { %v564_v34 = vld [vmem:[#allocation6] sm:$0xff]  }
  0x2e   :  { %v429_v35 = vld [vmem:[%s736_s4] ss:$0 sm:$0xff] }
  0x2f   :  { %479 = vmatpush3.bf16.msra.mxu0 %v543_v3  ;;  %499 = vmatpush3.bf16.msra.mxu1 %v551_v8  ;;  %v438_v43 = vld [vmem:[%s738_s6] ss:$0 sm:$0xff] }
  0x30   :  { %480 = vmatprep.subr.bf16.mxu0 %v636_v0  ;;  %500 = vmatprep.subr.bf16.mxu1 %v636_v0 }
  0x33   :  { %481 = vmatpush3.bf16.msra.mxu0 %v544_v5  ;;  %501 = vmatpush3.bf16.msra.mxu1 %v552_v10 }
  0x34   :  { %482 = vmatprep.subr.bf16.mxu0 %v636_v0  ;;  %502 = vmatprep.subr.bf16.mxu1 %v636_v0 }
  0x37   :  { %483 = vmatpush3.bf16.msra.mxu0 %v545_v7  ;;  %503 = vmatpush3.bf16.msra.mxu1 %v553_v12 }
  0x38   :  { %484 = vmatprep.subr.bf16.mxu0 %v636_v0  ;;  %504 = vmatprep.subr.bf16.mxu1 %v636_v0 }
  0x3b   :  { %485 = vmatpush3.bf16.msra.mxu0 %v546_v9  ;;  %505 = vmatpush3.bf16.msra.mxu1 %v554_v15 }
  0x3c   :  { %486 = vmatprep.subr.bf16.mxu0 %v636_v0  ;;  %506 = vmatprep.subr.bf16.mxu1 %v636_v0 }
  0x3f   :  { %487 = vmatpush3.bf16.msra.mxu0 %v547_v11  ;;  %507 = vmatpush3.bf16.msra.mxu1 %v555_v17 }
  0x40   :  { %488 = vmatprep.subr.bf16.mxu0 %v636_v0  ;;  %508 = vmatprep.subr.bf16.mxu1 %v636_v0 }
  0x43   :  { %489 = vmatpush3.bf16.msra.mxu0 %v548_v13  ;;  %509 = vmatpush3.bf16.msra.mxu1 %v556_v18 }
  0x44   :  { %514 = vmatprep.subr.bf16.mxu0 %v636_v0 }
  0x46   :  { %491 = vmatmul.mubr.msk.bf16.vlgmr.msra.gmra.mxu0 %vm426_vm2, %v427_v16 }
  0x47   :  { %530 = vmatprep.mubr.msk.bf16.mxu0 %vm637_vm0, %v636_v0  ;;  %515 = vmatpush3.bf16.msra.mxu0 %v557_v19 }
  0x48   :  { %516 = vmatprep.subr.bf16.mxu0 %v636_v0 }
  0x4b   :  { %517 = vmatpush3.bf16.msra.mxu0 %v558_v20 }
  0x4c   :  { %518 = vmatprep.subr.bf16.mxu0 %v636_v0 }
  0x4f   :  { %519 = vmatpush3.bf16.msra.mxu0 %v559_v21 }
  0x50   :  { %520 = vmatprep.subr.bf16.mxu0 %v636_v0 }
  0x53   :  { %521 = vmatpush3.bf16.msra.mxu0 %v560_v22 }
  0x54   :  { %522 = vmatprep.subr.bf16.mxu0 %v636_v0 }
  0x57   :  { %523 = vmatpush3.bf16.msra.mxu0 %v561_v23 }
  0x58   :  { %524 = vmatprep.subr.bf16.mxu0 %v636_v0 }
  0x5b   :  { %525 = vmatpush3.bf16.msra.mxu0 %v562_v24 }
  0x5c   :  { %526 = vmatprep.subr.bf16.mxu0 %v636_v0 }
  0x5f   :  { %527 = vmatpush3.bf16.msra.mxu0 %v563_v33 }
  0x60   :  { %528 = vmatprep.subr.bf16.mxu0 %v636_v0 }
  0x63   :  { %529 = vmatpush3.bf16.msra.mxu0 %v564_v34 }
 0x106   :  { %v177_v26 = vpop.f32.mrf.mxu0 }
 0x107   :  { %v178_v27 = vadd.f32 %v417_v25, %v177_v26 }
 0x108   :  { %v492_v28 = vpop.f32.mrf.mxu0 }
 0x109   :  { %v183_v29 = vmax.f32 %v178_v27, 0.0 }
 0x10a   :  { %v180_v30 = vpop.f32.mrf.mxu0 }
 0x10b   :  { %v201_v31 = vpack.c.bf16 %v183_v29, %v183_v29 }
 0x10c   :  { %v493_v32 = vpop.f32.mrf.mxu0 }
 0x10d   :  { %511 = vmatmul.mubr.bf16.vlgmr.msra.gmra.mxu1 %v201_v31 }
 0x1cd   :  { %v290_v36 = vpop.f32.mrf.mxu1 }
 0x1ce   :  { %v291_v37 = vadd.f32 %v429_v35, %v290_v36 }
 0x1cf   :  { %v512_v38 = vpop.f32.mrf.mxu1 }
 0x1d0   :  { %v296_v39 = vmax.f32 %v291_v37, 0.0 }
 0x1d1   :  { %v293_v40 = vpop.f32.mrf.mxu1 }
 0x1d2   :  { %v314_v41 = vpack.c.bf16 %v296_v39, %v296_v39 }
 0x1d3   :  { %v513_v42 = vpop.f32.mrf.mxu1 }
 0x1d4   :  { %531 = vmatmul.mubr.bf16.vlgmr.msra.gmra.mxu0 %v314_v41 }
 0x294   :  { %v403_v44 = vpop.f32.mrf.mxu0 }
 0x295   :  { %v404_v45 = vadd.f32 %v438_v43, %v403_v44 }
 0x296   :  { %v532_v46 = vpop.f32.mrf.mxu0 }
 0x297   :  { %565 = vtanh.f32 %v404_v45 }
 0x298   :  { %v406_v47 = vpop.f32.mrf.mxu0 }
 0x29a   :  { %v533_v48 = vpop.f32.mrf.mxu0 }
 0x2a4   :  { %v566_v49 = vpop.eup %565 }
 0x2a5   :  { %410 = vst [vmem:[%s739_s7] sm:$0xff] %v566_v49 }
 0x2a6   :  { %415 = vsyncpa [#allocation3], 1 }
 0x2a7   :  { %416 = vsyncpa [#allocation5], 1 }

</bundles_post_ra>
